<compile_context>
chip_gen: v5e
topology: v5e:2x2
jax: 0.10.0
libtpu: 0.0.40
codegen_flags: <defaults>
</compile_context>

<pallas_src>
import jax
import jax.numpy as jnp
from jax.experimental import pallas as pl
from jax.experimental.pallas import tpu as pltpu

EPS = 1e-5
NEG_SLOPE = 0.2


def _round_up(x, m):
    return (x + m - 1) // m * m


# ---------------- Pass 1: conv-as-matmul + per-tile BN moment partials -----------


def conv_moments_kernel(p_ref, w_ref, y_ref, s1_ref, s2_ref):
    # MXU matmul: bf16 inputs, f32 accumulation.
    y = jnp.dot(p_ref[...], w_ref[...], preferred_element_type=jnp.float32)
    y_ref[...] = y

    # Per-channel partial moments for this M tile.  Broadcast across 8 sublanes so
    # the output block stays (8, 128)-aligned; the wrapper divides the reduction by 8.
    s1 = jnp.sum(y, axis=0, keepdims=True)
    s2 = jnp.sum(y * y, axis=0, keepdims=True)
    s1_ref[...] = jnp.broadcast_to(s1, s1_ref.shape)
    s2_ref[...] = jnp.broadcast_to(s2, s2_ref.shape)


# ---------------- Pass 2: fused BN scale/shift + LeakyReLU ------------------------


def bn_lrelu_kernel(y_ref, scale_ref, shift_ref, o_ref):
    z = y_ref[...] * scale_ref[...] + shift_ref[...]
    o_ref[...] = jnp.where(z > 0, z, NEG_SLOPE * z).astype(o_ref.dtype)


# ---------------- Wrapper ---------------------------------------------------------


def _im2col_reflect(x, stride):
    """x: (N, C, H, W) -> bf16 (M, C*16) patch matrix; reflect pad=1, kernel=4."""
    n, c, h, w = x.shape
    # TODO(synk): move the unfold into the kernel (manual-DMA halo'ed blocks on the
    # padded NHWC input) to remove the 16x im2col HBM inflation; patches are emitted
    # in bf16 here to at least halve that traffic.
    xp = jnp.pad(x.astype(jnp.bfloat16), ((0, 0), (0, 0), (1, 1), (1, 1)),
                 mode="reflect")
    h_out = (h + 2 - 4) // stride + 1
    w_out = (w + 2 - 4) // stride + 1
    cols = []
    for kh in range(4):
        for kw in range(4):
            cols.append(
                xp[:, :,
                   kh:kh + stride * (h_out - 1) + 1:stride,
                   kw:kw + stride * (w_out - 1) + 1:stride])  # (N, C, Ho, Wo)
    p = jnp.stack(cols, axis=2)                                # (N, C, 16, Ho, Wo)
    # Column order c*16 + kh*4 + kw == PyTorch OIHW weight flatten order.
    p = jnp.transpose(p, (0, 3, 4, 1, 2)).reshape(n * h_out * w_out, c * 16)
    return p, h_out, w_out


def _pick_tile_m(m, k_pad, c_pad, budget=24 * 1024 * 1024):
    """Largest M tile whose double-buffered working set fits the VMEM budget."""
    row_bytes = 2 * (k_pad * 2) + 2 * (c_pad * 4)     # bf16 patch tile + f32 y tile
    weight_bytes = 2 * (k_pad * c_pad * 2)            # resident weight (conservative x2)
    avail = max(budget - weight_bytes, 2 * 1024 * 1024)
    tm = max(128, min(1024, (avail // row_bytes) // 128 * 128))
    if m < tm:
        tm = _round_up(m, 8)
    return tm


def cnn_block_forward(x, weight, gamma, beta, stride):
    """x: (N, C_in, H, W). weight: (C_out, C_in, 4, 4). Returns NCHW output."""
    n, c_in, h, w = x.shape
    c_out = weight.shape[0]

    patches, h_out, w_out = _im2col_reflect(x, stride)
    m, k = patches.shape

    # Lane-dense padding of the contraction and output-channel dims.
    k_pad = _round_up(k, 128)
    c_pad = _round_up(c_out, 128)

    tm = _pick_tile_m(m, k_pad, c_pad)
    m_pad = _round_up(m, tm)
    n_tiles = m_pad // tm

    patches = jnp.pad(patches, ((0, m_pad - m), (0, k_pad - k)))
    w_mat = weight.reshape(c_out, c_in * 16).T.astype(jnp.bfloat16)   # (K, C_out)
    w_mat = jnp.pad(w_mat, ((0, k_pad - k), (0, c_pad - c_out)))
    gamma_p = jnp.pad(gamma.astype(jnp.float32), (0, c_pad - c_out)).reshape(1, c_pad)
    beta_p = jnp.pad(beta.astype(jnp.float32), (0, c_pad - c_out)).reshape(1, c_pad)

    cparams = pltpu.CompilerParams(
        dimension_semantics=("parallel",),
        vmem_limit_bytes=48 * 1024 * 1024)

    # ---- Pass 1: tiled matmul + per-tile per-channel sum / sum-of-squares.
    y_flat, s1_part, s2_part = pl.pallas_call(
        conv_moments_kernel,
        out_shape=(
            jax.ShapeDtypeStruct((m_pad, c_pad), jnp.float32),
            jax.ShapeDtypeStruct((n_tiles * 8, c_pad), jnp.float32),
            jax.ShapeDtypeStruct((n_tiles * 8, c_pad), jnp.float32),
        ),
        grid_spec=pltpu.PrefetchScalarGridSpec(
            num_scalar_prefetch=0,
            grid=(n_tiles,),
            in_specs=[
                pl.BlockSpec((tm, k_pad), lambda i: (i, 0)),
                pl.BlockSpec((k_pad, c_pad), lambda i: (0, 0)),   # resident weight
            ],
            out_specs=[
                pl.BlockSpec((tm, c_pad), lambda i: (i, 0)),
                pl.BlockSpec((8, c_pad), lambda i: (i, 0)),
                pl.BlockSpec((8, c_pad), lambda i: (i, 0)),
            ],
        ),
        compiler_params=cparams,
    )(patches, w_mat)

    # Partial moments were broadcast across 8 sublanes -> divide by 8 (exact in fp).
    s1 = jnp.sum(s1_part, axis=0, keepdims=True) / 8.0
    s2 = jnp.sum(s2_part, axis=0, keepdims=True) / 8.0

    # Fold BN (training mode, biased variance) into one scale/shift per channel.
    # Zero-padded M rows contribute 0 to both moments, so divide by the true M.
    mean = s1 / m
    var = jnp.maximum(s2 / m - mean * mean, 0.0)
    scale = gamma_p * jax.lax.rsqrt(var + EPS)
    shift = beta_p - mean * scale

    # ---- Pass 2: fused normalize + LeakyReLU, fully parallel over M tiles.
    out_flat = pl.pallas_call(
        bn_lrelu_kernel,
        out_shape=jax.ShapeDtypeStruct((m_pad, c_pad), jnp.float32),
        grid_spec=pltpu.PrefetchScalarGridSpec(
            num_scalar_prefetch=0,
            grid=(n_tiles,),
            in_specs=[
                pl.BlockSpec((tm, c_pad), lambda i: (i, 0)),
                pl.BlockSpec((1, c_pad), lambda i: (0, 0)),
                pl.BlockSpec((1, c_pad), lambda i: (0, 0)),
            ],
            out_specs=pl.BlockSpec((tm, c_pad), lambda i: (i, 0)),
        ),
        compiler_params=cparams,
    )(y_flat, scale, shift)

    out = out_flat[:m, :c_out].reshape(n, h_out, w_out, c_out)
    # TODO(synk): keep NHWC downstream to avoid this extra full-tensor transpose.
    return out.transpose(0, 3, 1, 2)


def _reference(x, weight, gamma, beta, stride):
    """Pure-JAX f32 reference for verification."""
    xp = jnp.pad(x, ((0, 0), (0, 0), (1, 1), (1, 1)), mode="reflect")
    y = jax.lax.conv_general_dilated(
        xp.astype(jnp.float32), weight.astype(jnp.float32),
        window_strides=(stride, stride), padding="VALID",
        dimension_numbers=("NCHW", "OIHW", "NCHW"))
    mean = jnp.mean(y, axis=(0, 2, 3), keepdims=True)
    var = jnp.mean((y - mean) ** 2, axis=(0, 2, 3), keepdims=True)
    y_hat = (y - mean) / jnp.sqrt(var + EPS)
    z = y_hat * gamma.reshape(1, -1, 1, 1) + beta.reshape(1, -1, 1, 1)
    return jnp.where(z > 0, z, NEG_SLOPE * z)


if __name__ == "__main__":
    # Small shapes: batch=2, in_channels=4, out_channels=8, spatial=16, stride=2
    N, C_IN, C_OUT, H, W, STRIDE = 2, 4, 8, 16, 16, 2

    key = jax.random.PRNGKey(0)
    kx, kw_, kg, kb = jax.random.split(key, 4)
    x = jax.random.normal(kx, (N, C_IN, H, W), dtype=jnp.float32)
    weight = 0.1 * jax.random.normal(kw_, (C_OUT, C_IN, 4, 4), dtype=jnp.float32)
    gamma = 1.0 + 0.1 * jax.random.normal(kg, (C_OUT,), dtype=jnp.float32)
    beta = 0.1 * jax.random.normal(kb, (C_OUT,), dtype=jnp.float32)

    out = cnn_block_forward(x, weight, gamma, beta, STRIDE)
    out = jax.block_until_ready(out)

    ref = jax.block_until_ready(_reference(x, weight, gamma, beta, STRIDE))
    assert out.shape == ref.shape, (out.shape, ref.shape)
    # Tolerance relaxed vs pure-f32 reference: the matmul runs bf16-in / f32-acc on the MXU.
    max_err = float(jnp.max(jnp.abs(out - ref)))
    assert max_err < 5e-2, max_err

    print("KERNEL_OK")
</pallas_src>

<mosaic_0001>
module attributes {stable_mosaic.version = 11 : i64} {
  func.func @conv_moments_kernel(%arg0: i32, %arg1: memref<128x128xbf16, #tpu.memory_space<vmem>>, %arg2: memref<128x128xbf16, #tpu.memory_space<vmem>>, %arg3: memref<128x128xf32, #tpu.memory_space<vmem>>, %arg4: memref<8x128xf32, #tpu.memory_space<vmem>>, %arg5: memref<8x128xf32, #tpu.memory_space<vmem>>) attributes {dimension_semantics = [#tpu.dimension_semantics<parallel>], iteration_bounds = array<i64: 1>, scalar_prefetch = 0 : i64, scratch_operands = 0 : i64, tpu.core_type = #tpu.core_type<tc>, window_params = [{transform_indices = @transform_0, window_bounds = array<i64: 128, 128>}, {pipeline_mode = #tpu.pipeline_mode<synchronous>, transform_indices = @transform_1, window_bounds = array<i64: 128, 128>}, {transform_indices = @transform_2, window_bounds = array<i64: 128, 128>}, {transform_indices = @transform_3, window_bounds = array<i64: 8, 128>}, {transform_indices = @transform_4, window_bounds = array<i64: 8, 128>}]} {
    %c0 = arith.constant 0 : index
    %c0_0 = arith.constant 0 : index
    %0 = vector.load %arg1[%c0, %c0_0] : memref<128x128xbf16, #tpu.memory_space<vmem>>, vector<128x128xbf16>
    %c0_1 = arith.constant 0 : index
    %c0_2 = arith.constant 0 : index
    %1 = vector.load %arg2[%c0_1, %c0_2] : memref<128x128xbf16, #tpu.memory_space<vmem>>, vector<128x128xbf16>
    %cst = arith.constant dense<0.000000e+00> : vector<128x128xf32>
    %2 = tpu.matmul %0, %1, %cst {dimension_numbers = #tpu.dot_dimension_numbers<[1], [0], [0], [1], [0, 0, 1, 1], [], []>} : vector<128x128xbf16>, vector<128x128xbf16>, vector<128x128xf32> -> vector<128x128xf32>
    %c0_3 = arith.constant 0 : index
    %c0_4 = arith.constant 0 : index
    %3 = vector.load %arg3[%c0_3, %c0_4] : memref<128x128xf32, #tpu.memory_space<vmem>>, vector<128x128xf32>
    tpu.vector_store %arg3[%c0_3, %c0_4], %2 {strides = array<i32>} : memref<128x128xf32, #tpu.memory_space<vmem>>, vector<128x128xf32>,
    %cst_5 = arith.constant dense<0.000000e+00> : vector<128xf32>
    %4 = vector.multi_reduction <add>, %2, %cst_5 [0] : vector<128x128xf32> to vector<128xf32>
    %5 = vector.shape_cast %4 : vector<128xf32> to vector<1x128xf32>
    %6 = arith.mulf %2, %2 : vector<128x128xf32>
    %cst_6 = arith.constant dense<0.000000e+00> : vector<128xf32>
    %7 = vector.multi_reduction <add>, %6, %cst_6 [0] : vector<128x128xf32> to vector<128xf32>
    %8 = vector.shape_cast %7 : vector<128xf32> to vector<1x128xf32>
    %9 = vector.shape_cast %5 : vector<1x128xf32> to vector<1x128xf32>
    %10 = vector.broadcast %9 : vector<1x128xf32> to vector<8x128xf32>
    %c0_7 = arith.constant 0 : index
    %c0_8 = arith.constant 0 : index
    %11 = vector.load %arg4[%c0_7, %c0_8] : memref<8x128xf32, #tpu.memory_space<vmem>>, vector<8x128xf32>
    tpu.vector_store %arg4[%c0_7, %c0_8], %10 {strides = array<i32>} : memref<8x128xf32, #tpu.memory_space<vmem>>, vector<8x128xf32>,
    %12 = vector.shape_cast %8 : vector<1x128xf32> to vector<1x128xf32>
    %13 = vector.broadcast %12 : vector<1x128xf32> to vector<8x128xf32>
    %c0_9 = arith.constant 0 : index
    %c0_10 = arith.constant 0 : index
    %14 = vector.load %arg5[%c0_9, %c0_10] : memref<8x128xf32, #tpu.memory_space<vmem>>, vector<8x128xf32>
    tpu.vector_store %arg5[%c0_9, %c0_10], %13 {strides = array<i32>} : memref<8x128xf32, #tpu.memory_space<vmem>>, vector<8x128xf32>,
    return
  }
  func.func @transform_0(%arg0: i32) -> (i32, i32) {
    %c0_i32 = arith.constant 0 : i32
    %c0_i32_0 = arith.constant 0 : i32
    return %arg0, %c0_i32 : i32, i32
  }
  func.func @transform_1(%arg0: i32) -> (i32, i32) {
    %c0_i32 = arith.constant 0 : i32
    %c0_i32_0 = arith.constant 0 : i32
    %c0_i32_1 = arith.constant 0 : i32
    return %c0_i32, %c0_i32_0 : i32, i32
  }
  func.func @transform_2(%arg0: i32) -> (i32, i32) {
    %c0_i32 = arith.constant 0 : i32
    %c0_i32_0 = arith.constant 0 : i32
    return %arg0, %c0_i32 : i32, i32
  }
  func.func @transform_3(%arg0: i32) -> (i32, i32) {
    %c0_i32 = arith.constant 0 : i32
    %c0_i32_0 = arith.constant 0 : i32
    return %arg0, %c0_i32 : i32, i32
  }
  func.func @transform_4(%arg0: i32) -> (i32, i32) {
    %c0_i32 = arith.constant 0 : i32
    %c0_i32_0 = arith.constant 0 : i32
    return %arg0, %c0_i32 : i32, i32
  }
}

</mosaic_0001>

<bundles_post_ra>
// kernel: tpu_custom_call.1
= control target key start
LH: loop header
LB: loop body
LE: loop exit
PB: predicated region body
PF: predicated region fallthrough
CT: control target
= control target key end

     0   :  { %10 = vsyncpa [#allocation3], 0  ;;  %s654_s0 = inlined_call_operand.hbm [shape: bf16[128,128], index: 0, kind: input, shape index: {}]   ;;  %s655_s1 = inlined_call_operand.hbm [shape: bf16[128,128], index: 1, kind: input, shape index: {}]   ;;  %s656_s2 = inlined_call_operand.hbm [shape: f32[128,128], index: 2, kind: output, shape index: {0}]   ;;  %s657_s3 = inlined_call_operand.hbm [shape: f32[8,128], index: 3, kind: output, shape index: {1}]   ;;  %s658_s4 = inlined_call_operand.hbm [shape: f32[8,128], index: 4, kind: output, shape index: {2}]  }
   0x1   :  { %11 = vsyncpa [#allocation6], 0 }
   0x2   :  { %12 = vsyncpa [#allocation4], 0 }
   0x3   :  { %13 = vsyncpa [#allocation9], 0  ;;  %s18_s17 = sshll.u32 %s654_s0, 4  ;;  %s593_s18 = smov [#allocation2]   ;;  %s19_s17 = int_to_ptr.hbm [resolvable:$true] %s18_s17 }
   0x4   :  { %s20_s19 = sshll.u32 %s593_s18, 4  ;;  %s31_s22 = sshll.u32 %s655_s1, 4  ;;  %s21_s19 = int_to_ptr.vmem [resolvable:$true] %s20_s19  ;;  %s32_s22 = int_to_ptr.hbm [resolvable:$true] %s31_s22 }
   0x5   :  { %s594_s23 = smov 64   ;;  %s595_s24 = smov 4  }
   0x6   :  { %26 = dma.hbm_to_vmem [thread:$0]  %s19_s17, 1024, %s21_s19, [#allocation3], %s594_s23, %s594_s23, %s595_s24  }
   0x7   :  { %s596_s25 = smov [#allocation5]  }
   0x8   :  { %s33_s26 = sshll.u32 %s596_s25, 4  ;;  %s34_s26 = int_to_ptr.vmem [resolvable:$true] %s33_s26 }
   0x9   :  { %39 = dma.hbm_to_vmem [thread:$0]  %s32_s22, 1024, %s34_s26, [#allocation6], %s594_s23, %s594_s23, %s595_s24  }
   0xa   :  { %585 = dma.done.wait [#allocation3], 1024  }
   0xb   :  { %586 = vsyncadd [#allocation3], 4294966272 }
   0xc   :  { %587 = dma.done.wait [#allocation6], 1024  }
   0xd   :  { %588 = vsyncadd [#allocation6], 4294966272  ;;  %v431_v0 = vld [vmem:[#allocation5 + $0x38] sm:$0xff]  ;;  %v430_v1 = vld [vmem:[#allocation5 + $0x30] sm:$0xff]  ;;  %s597_s0 = smov [#allocation7]   ;;  %s307_s29 = sshll.u32 %s656_s2, 4  ;;  %s308_s29 = int_to_ptr.hbm [resolvable:$true] %s307_s29 }
   0xe   :  { %176 = vmatpush.bf16.msra.mxu0 %v431_v0  ;;  %432 = vmatpush.bf16.msra.mxu1 %v431_v0  ;;  %v429_v2 = vld [vmem:[#allocation5 + $0x28] sm:$0xff]  ;;  %v428_v3 = vld [vmem:[#allocation5 + $0x20] sm:$0xff]  ;;  %v427_v4 = vld [vmem:[#allocation5 + $0x18] sm:$0xff]  ;;  %s305_s1 = sshll.u32 %s597_s0, 4  ;;  %s598_s30 = smov 128   ;;  %s306_s1 = int_to_ptr.vmem [resolvable:$true] %s305_s1 }
   0xf   :  { %433 = vmatpush.bf16.msra.mxu2 %v431_v0  ;;  %434 = vmatpush.bf16.msra.mxu3 %v431_v0  ;;  %v426_v5 = vld [vmem:[#allocation5 + $0x10] sm:$0xff]  ;;  %v425_v6 = vld [vmem:[#allocation5 + $0x8] sm:$0xff]  ;;  %v424_v7 = vld [vmem:[#allocation5] sm:$0xff]  ;;  %s599_s5 = smov 8   ;;  %s600_s2 = smov [#allocation8]  }
  0x10   :  { %v416_v8 = vld [vmem:[#allocation2] sm:$0xff]  ;;  %v418_v9 = vld [vmem:[#allocation2 + $0x10] sm:$0xff]  ;;  %v417_v12 = vld [vmem:[#allocation2 + $0x8] sm:$0xff]  ;;  %s319_s6 = sshll.u32 %s600_s2, 4  ;;  %s321_s9 = sshll.u32 %s657_s3, 4  ;;  %s320_s6 = int_to_ptr.vmem [resolvable:$true] %s319_s6  ;;  %s322_s9 = int_to_ptr.hbm [resolvable:$true] %s321_s9 }
  0x11   :  { %v420_v10 = vld [vmem:[#allocation2 + $0x20] sm:$0xff]  ;;  %v422_v11 = vld [vmem:[#allocation2 + $0x30] sm:$0xff]  ;;  %v419_v13 = vld [vmem:[#allocation2 + $0x18] sm:$0xff]  ;;  %s601_s10 = smov [#allocation10]   ;;  %s332_s14 = sshll.u32 %s658_s4, 4  ;;  %s333_s14 = int_to_ptr.hbm [resolvable:$true] %s332_s14 }
  0x12   :  { %177 = vmatpush.bf16.msra.mxu0 %v430_v1  ;;  %435 = vmatpush.bf16.msra.mxu1 %v430_v1  ;;  %v421_v14 = vld [vmem:[#allocation2 + $0x28] sm:$0xff]  ;;  %v423_v15 = vld [vmem:[#allocation2 + $0x38] sm:$0xff]  ;;  %s330_s11 = sshll.u32 %s601_s10, 4  ;;  %s331_s11 = int_to_ptr.vmem [resolvable:$true] %s330_s11 }
  0x13   :  { %436 = vmatpush.bf16.msra.mxu2 %v430_v1  ;;  %437 = vmatpush.bf16.msra.mxu3 %v430_v1 }
  0x16   :  { %178 = vmatpush.bf16.msra.mxu0 %v429_v2  ;;  %438 = vmatpush.bf16.msra.mxu1 %v429_v2 }
  0x17   :  { %439 = vmatpush.bf16.msra.mxu2 %v429_v2  ;;  %440 = vmatpush.bf16.msra.mxu3 %v429_v2 }
  0x1a   :  { %179 = vmatpush.bf16.msra.mxu0 %v428_v3  ;;  %441 = vmatpush.bf16.msra.mxu1 %v428_v3 }
  0x1b   :  { %442 = vmatpush.bf16.msra.mxu2 %v428_v3  ;;  %443 = vmatpush.bf16.msra.mxu3 %v428_v3 }
  0x1e   :  { %180 = vmatpush.bf16.msra.mxu0 %v427_v4  ;;  %444 = vmatpush.bf16.msra.mxu1 %v427_v4 }
  0x1f   :  { %445 = vmatpush.bf16.msra.mxu2 %v427_v4  ;;  %446 = vmatpush.bf16.msra.mxu3 %v427_v4 }
  0x22   :  { %181 = vmatpush.bf16.msra.mxu0 %v426_v5  ;;  %447 = vmatpush.bf16.msra.mxu1 %v426_v5 }
  0x23   :  { %448 = vmatpush.bf16.msra.mxu2 %v426_v5  ;;  %449 = vmatpush.bf16.msra.mxu3 %v426_v5 }
  0x26   :  { %182 = vmatpush.bf16.msra.mxu0 %v425_v6  ;;  %450 = vmatpush.bf16.msra.mxu1 %v425_v6 }
  0x27   :  { %451 = vmatpush.bf16.msra.mxu2 %v425_v6  ;;  %452 = vmatpush.bf16.msra.mxu3 %v425_v6 }
  0x2a   :  { %183 = vmatpush.bf16.msra.mxu0 %v424_v7  ;;  %453 = vmatpush.bf16.msra.mxu1 %v424_v7 }
  0x2b   :  { %454 = vmatpush.bf16.msra.mxu2 %v424_v7  ;;  %455 = vmatpush.bf16.msra.mxu3 %v424_v7 }
  0x2d   :  { %184 = vmatmul.bf16.vlgmr.msra.gmra.mxu0 %v416_v8  ;;  %194 = vmatmul.bf16.vlgmr.msra.gmra.mxu1 %v418_v9 }
  0x2e   :  { %204 = vmatmul.bf16.vlgmr.msra.gmra.mxu2 %v420_v10  ;;  %214 = vmatmul.bf16.vlgmr.msra.gmra.mxu3 %v422_v11 }
  0x3d   :  { %189 = vmatmul.bf16.gmra.mxu0 %v417_v12  ;;  %199 = vmatmul.bf16.gmra.mxu1 %v419_v13 }
  0x3e   :  { %209 = vmatmul.bf16.gmra.mxu2 %v421_v14  ;;  %219 = vmatmul.bf16.gmra.mxu3 %v423_v15 }
  0xaa   :  { %v185_v16 = vpop.f32.mrf.mxu0  ;;  %v195_v17 = vpop.f32.mrf.mxu1 }
  0xab   :  { %225 = vst [vmem:[#allocation7] sm:$0xff] %v185_v16  ;;  %v262_v27 = vmul.f32 %v185_v16, %v185_v16  ;;  %v266_v39 = vmul.f32 %v195_v17, %v195_v17 }
  0xac   :  { %229 = vst [vmem:[#allocation7 + $0x20] sm:$0xff] %v195_v17 }
  0xb1   :  { %v205_v18 = vpop.f32.mrf.mxu2  ;;  %v633_v19 = vpop.f32.mrf.mxu3 }
  0xb2   :  { %v187_v20 = vpop.f32.mrf.mxu0  ;;  %v197_v21 = vpop.f32.mrf.mxu1  ;;  %233 = vst [vmem:[#allocation7 + $0x40] sm:$0xff] %v205_v18  ;;  %v270_v53 = vmul.f32 %v205_v18, %v205_v18  ;;  %v274_v1 = vmul.f32 %v633_v19, %v633_v19 }
  0xb3   :  { %226 = vst [vmem:[#allocation7 + $0x8] sm:$0xff] %v187_v20  ;;  %v263_v26 = vmul.f32 %v187_v20, %v187_v20  ;;  %v241_v28 = vadd.f32 %v187_v20, %v185_v16  ;;  %v267_v42 = vmul.f32 %v197_v21, %v197_v21 }
  0xb4   :  { %230 = vst [vmem:[#allocation7 + $0x28] sm:$0xff] %v197_v21 }
  0xb5   :  { %237 = vst [vmem:[#allocation7 + $0x60] sm:$0xff] %v633_v19  ;;  %v278_v30 = vadd.f32 %v263_v26, %v262_v27 }
  0xb9   :  { %v207_v22 = vpop.f32.mrf.mxu2  ;;  %v636_v23 = vpop.f32.mrf.mxu3 }
  0xba   :  { %v190_v24 = vpop.f32.mrf.mxu0  ;;  %v200_v25 = vpop.f32.mrf.mxu1  ;;  %234 = vst [vmem:[#allocation7 + $0x48] sm:$0xff] %v207_v22  ;;  %v271_v56 = vmul.f32 %v207_v22, %v207_v22  ;;  %v275_v4 = vmul.f32 %v636_v23, %v636_v23 }
  0xbb   :  { %227 = vst [vmem:[#allocation7 + $0x10] sm:$0xff] %v190_v24  ;;  %v264_v29 = vmul.f32 %v190_v24, %v190_v24  ;;  %v242_v31 = vadd.f32 %v241_v28, %v190_v24  ;;  %v268_v45 = vmul.f32 %v200_v25, %v200_v25 }
  0xbc   :  { %231 = vst [vmem:[#allocation7 + $0x30] sm:$0xff] %v200_v25 }
  0xbd   :  { %238 = vst [vmem:[#allocation7 + $0x68] sm:$0xff] %v636_v23  ;;  %v279_v36 = vadd.f32 %v278_v30, %v264_v29 }
  0xc1   :  { %v210_v32 = vpop.f32.mrf.mxu2  ;;  %v220_v33 = vpop.f32.mrf.mxu3 }
  0xc2   :  { %v192_v34 = vpop.f32.mrf.mxu0  ;;  %v202_v35 = vpop.f32.mrf.mxu1  ;;  %235 = vst [vmem:[#allocation7 + $0x50] sm:$0xff] %v210_v32  ;;  %v272_v60 = vmul.f32 %v210_v32, %v210_v32  ;;  %v276_v8 = vmul.f32 %v220_v33, %v220_v33 }
  0xc3   :  { %228 = vst [vmem:[#allocation7 + $0x18] sm:$0xff] %v192_v34  ;;  %v243_v37 = vadd.f32 %v242_v31, %v192_v34  ;;  %v265_v38 = vmul.f32 %v192_v34, %v192_v34  ;;  %v269_v51 = vmul.f32 %v202_v35, %v202_v35 }
  0xc4   :  { %232 = vst [vmem:[#allocation7 + $0x38] sm:$0xff] %v202_v35 }
  0xc5   :  { %v244_v40 = vadd.f32 %v243_v37, %v195_v17  ;;  %v280_v41 = vadd.f32 %v279_v36, %v265_v38  ;;  %239 = vst [vmem:[#allocation7 + $0x70] sm:$0xff] %v220_v33 }
  0xc7   :  { %v281_v43 = vadd.f32 %v280_v41, %v266_v39  ;;  %v245_v44 = vadd.f32 %v244_v40, %v197_v21 }
  0xc9   :  { %v246_v46 = vadd.f32 %v245_v44, %v200_v25  ;;  %v282_v47 = vadd.f32 %v281_v43, %v267_v42  ;;  %v212_v48 = vpop.f32.mrf.mxu2  ;;  %v222_v49 = vpop.f32.mrf.mxu3 }
  0xca   :  { %236 = vst [vmem:[#allocation7 + $0x58] sm:$0xff] %v212_v48  ;;  %v273_v0 = vmul.f32 %v212_v48, %v212_v48  ;;  %v277_v12 = vmul.f32 %v222_v49, %v222_v49 }
  0xcb   :  { %v247_v50 = vadd.f32 %v246_v46, %v202_v35  ;;  %v283_v52 = vadd.f32 %v282_v47, %v268_v45  ;;  %240 = vst [vmem:[#allocation7 + $0x78] sm:$0xff] %v222_v49 }
  0xcc   :  { %313 = dma.vmem_to_hbm [thread:$0]  %s306_s1, 2048, %s308_s29, [#allocation4], %s598_s30, %s598_s30, %s599_s5  }
  0xcd   :  { %v248_v54 = vadd.f32 %v247_v50, %v205_v18  ;;  %v284_v55 = vadd.f32 %v283_v52, %v269_v51 }
  0xcf   :  { %v285_v57 = vadd.f32 %v284_v55, %v270_v53  ;;  %v249_v58 = vadd.f32 %v248_v54, %v207_v22 }
  0xd1   :  { %v250_v59 = vadd.f32 %v249_v58, %v210_v32  ;;  %v286_v61 = vadd.f32 %v285_v57, %v271_v56 }
  0xd3   :  { %v287_v62 = vadd.f32 %v286_v61, %v272_v60  ;;  %v251_v63 = vadd.f32 %v250_v59, %v212_v48 }
  0xd5   :  { %v252_v2 = vadd.f32 %v251_v63, %v633_v19  ;;  %v288_v3 = vadd.f32 %v287_v62, %v273_v0 }
  0xd7   :  { %v289_v5 = vadd.f32 %v288_v3, %v274_v1  ;;  %v253_v6 = vadd.f32 %v252_v2, %v636_v23 }
  0xd9   :  { %v254_v7 = vadd.f32 %v253_v6, %v220_v33  ;;  %v290_v9 = vadd.f32 %v289_v5, %v275_v4 }
  0xdb   :  { %v291_v10 = vadd.f32 %v290_v9, %v276_v8  ;;  %v255_v11 = vadd.f32 %v254_v7, %v222_v49 }
  0xdd   :  { %v256_v13 = vrot.slane %v255_v11, 4  ;;  %v292_v14 = vadd.f32 %v291_v10, %v277_v12 }
  0xdf   :  { %v257_v15 = vadd.f32 %v256_v13, %v255_v11  ;;  %v293_v16 = vrot.slane %v292_v14, 4 }
  0xe1   :  { %v258_v17 = vrot.slane %v257_v15, 2  ;;  %v294_v18 = vadd.f32 %v293_v16, %v292_v14 }
  0xe3   :  { %v259_v19 = vadd.f32 %v258_v17, %v257_v15  ;;  %v295_v20 = vrot.slane %v294_v18, 2 }
  0xe5   :  { %v296_v21 = vadd.f32 %v295_v20, %v294_v18  ;;  %v260_v22 = vrot.slane %v259_v19, 1 }
  0xe7   :  { %v261_v23 = vadd.f32 %v260_v22, %v259_v19  ;;  %v297_v24 = vrot.slane %v296_v21, 1 }
  0xe9   :  { %299 = vst [vmem:[#allocation8] sm:$0xff] %v261_v23  ;;  %v298_v25 = vadd.f32 %v297_v24, %v296_v21 }
  0xea   :  { %324 = dma.vmem_to_hbm [thread:$0]  %s320_s6, 128, %s322_s9, [#allocation9]  }
  0xeb   :  { %300 = vst [vmem:[#allocation10] sm:$0xff] %v298_v25 }
  0xec   :  { %335 = dma.vmem_to_hbm [thread:$0]  %s331_s11, 128, %s333_s14, [#allocation9]  }
  0xed   :  { %589 = dma.done.wait [#allocation4], 2048  }
  0xee   :  { %590 = vsyncadd [#allocation4], 4294965248 }
  0xef   :  { %591 = dma.done.wait [#allocation9], 256  }
  0xf0   :  { %592 = vsyncadd [#allocation9], 4294967040 }
  0xf1   :  { %348 = vsyncpa [#allocation3], 1 }
  0xf2   :  { %349 = vsyncpa [#allocation6], 1 }
  0xf3   :  { %350 = vsyncpa [#allocation4], 1 }
  0xf4   :  { %351 = vsyncpa [#allocation9], 1 }

</bundles_post_ra>
